<compile_context>
chip_gen: v7x
topology: tpu7x:2x2x1
jax: 0.10.0
libtpu: 0.0.40
codegen_flags: <defaults>
</compile_context>

<pallas_src>
import functools

import jax
import jax.numpy as jnp
from jax import lax
from jax.experimental import pallas as pl
from jax.experimental.pallas import tpu as pltpu

_LANES = 128


def _partial_sum_kernel(x_ref, out_ref, *, rows_valid, block_rows, need_mask):
    """Lane-dense per-block partial sum.

    x_ref:   VMEM (block_rows, 128) slice of lane-dense Xi (source dtype)
    out_ref: VMEM (1, 128) f32 per-block partial sums (one partial per lane)
    """
    x = x_ref[...].astype(jnp.float32)
    if need_mask:
        # Only the last block can be partial; mask rows past the valid extent
        # (their contents are unspecified when the block overruns the array).
        row = pl.program_id(0) * block_rows + lax.broadcasted_iota(
            jnp.int32, x.shape, 0)
        x = jnp.where(row < rows_valid, x, 0.0)
    out_ref[...] = jnp.sum(x, axis=0, keepdims=True)


@functools.partial(jax.jit, static_argnames=("block_rows",))
def fm_forward(Xi, v, w, w0=0.0, *, block_rows=16384):
    """Pallas implementation of FM.forward. Returns a scalar (f32)."""
    del v  # With n == 1 the v-interaction term is identically zero (see header).
    # Multiple of 16 keeps (8,128) f32 tiles and 16-row bf16 sublane packing legal.
    assert block_rows % 16 == 0

    # Mirror the torch view(): drop a trailing singleton dim.
    if Xi.ndim == 3 and Xi.shape[-1] == 1:
        Xi = Xi.reshape(Xi.shape[0], Xi.shape[1])
    m, n = Xi.shape
    assert n == 1, "torch.mm(Xi, v.t()) only type-checks when Xi has 1 column"

    flat = Xi.reshape(-1)  # contiguous (m, 1) -> (m,): layout-preserving

    rows = m // _LANES
    tail = m - rows * _LANES
    if rows == 0:
        # Tiny input (< 128 elements): pad a single row (< 512 B, negligible).
        x = jnp.pad(flat, (0, _LANES - m)).reshape(1, _LANES)
        rows, tail = 1, 0
        tail_sum = jnp.float32(0.0)
    else:
        # Divisible prefix only: no full padded copy of Xi is materialized.
        x = flat[: rows * _LANES].reshape(rows, _LANES)
        if tail:
            tail_sum = jnp.sum(flat[rows * _LANES:].astype(jnp.float32))
        else:
            tail_sum = jnp.float32(0.0)

    # rows < block_rows -> single full-extent block (always a legal tile shape).
    br = min(block_rows, rows)
    grid_m = pl.cdiv(rows, br)
    need_mask = (rows % br) != 0

    kernel = functools.partial(
        _partial_sum_kernel, rows_valid=rows, block_rows=br, need_mask=need_mask)

    partials = pl.pallas_call(
        kernel,
        out_shape=jax.ShapeDtypeStruct((grid_m, _LANES), jnp.float32),
        grid_spec=pltpu.PrefetchScalarGridSpec(
            num_scalar_prefetch=0,
            grid=(grid_m,),
            in_specs=[pl.BlockSpec((br, _LANES), lambda i: (i, 0))],
            out_specs=pl.BlockSpec((1, _LANES), lambda i: (i, 0)),
        ),
        compiler_params=pltpu.CompilerParams(
            # Independent per-block outputs -> safe to shard across v7x's 2 TCs.
            dimension_semantics=("parallel",),
            # 8 MiB f32 blocks double-buffered + headroom; < 64 MiB v7x VMEM.
            vmem_limit_bytes=40 << 20,
        ),
    )(x)

    # Final tiny combine (fused into this jit): interaction term is exactly 0
    # when n == 1, so result = w0 + sum(Xi) * sum(w).
    sum_xi = jnp.sum(partials) + tail_sum
    sum_w = jnp.sum(w.astype(jnp.float32))
    return (jnp.asarray(w0, jnp.float32) + sum_xi * sum_w).reshape(())


def fm_forward_ref(Xi, v, w, w0=0.0):
    """Pure-JAX reference (mirrors the torch code literally)."""
    if Xi.ndim == 3 and Xi.shape[-1] == 1:
        Xi = Xi.reshape(Xi.shape[0], Xi.shape[1])
    Xi = Xi.astype(jnp.float32)
    inter_1 = Xi @ v.T
    inter_2 = (Xi ** 2) @ (v ** 2).T
    interaction = 0.5 * jnp.sum(inter_1 ** 2 - inter_2)
    return w0 + jnp.sum(Xi @ w.T) + interaction


if __name__ == "__main__":
    key = jax.random.PRNGKey(0)
    k_xi, k_w, k_xi2 = jax.random.split(key, 3)

    # Module config: len(feature_sizes) == 2  ->  L = 2.
    feature_sizes = [3, 5]
    L = len(feature_sizes)

    # Parameters matching __init__ shapes: w ~ randn((L,1)), v = ones((L,1)), w0 = 0.
    w = jax.random.normal(k_w, (L, 1), dtype=jnp.float32)
    v = jnp.ones((L, 1), dtype=jnp.float32)
    w0 = 0.0

    # Case 1: (m, 1, 1) input exercising the trailing-singleton squeeze and the
    # tiny single-row path.
    m1 = 8
    Xi1 = jax.random.normal(k_xi, (m1, 1, 1), dtype=jnp.float32)
    out1 = jax.block_until_ready(fm_forward(Xi1, v, w, w0))
    ref1 = fm_forward_ref(Xi1, v, w, w0)
    assert jnp.allclose(out1, ref1, atol=1e-3, rtol=1e-4), (out1, ref1)

    # Case 2: larger (m, 1) input exercising the divisible-prefix reshape,
    # wrapper-side tail sum, and a multi-block grid with a masked partial last
    # block (small block_rows forces several parallel grid steps).
    m2 = 5000
    Xi2 = jax.random.normal(k_xi2, (m2, 1), dtype=jnp.float32)
    out2 = jax.block_until_ready(fm_forward(Xi2, v, w, w0, block_rows=16))
    ref2 = fm_forward_ref(Xi2, v, w, w0)
    assert jnp.allclose(out2, ref2, atol=5e-3, rtol=1e-4), (out2, ref2)

    # Case 3: bf16 input with m divisible by 128 (pure bitcast reshape, no tail)
    # on the default large-block path.
    m3 = 4096
    Xi3 = jax.random.normal(k_xi, (m3, 1), dtype=jnp.float32).astype(jnp.bfloat16)
    out3 = jax.block_until_ready(fm_forward(Xi3, v, w, w0))
    ref3 = fm_forward_ref(Xi3, v, w, w0)
    assert jnp.allclose(out3, ref3, atol=5e-2, rtol=1e-2), (out3, ref3)

    print("KERNEL_OK")
</pallas_src>

<mosaic_0001>
module attributes {stable_mosaic.version = 11 : i64} {
  func.func @_partial_sum_kernel(%arg0: i32, %arg1: memref<1x128xf32, #tpu.memory_space<vmem>>, %arg2: memref<1x128xf32, #tpu.memory_space<vmem>>) attributes {dimension_semantics = [#tpu.dimension_semantics<parallel>], iteration_bounds = array<i64: 1>, scalar_prefetch = 0 : i64, scratch_operands = 0 : i64, tpu.core_type = #tpu.core_type<tc>, window_params = [{transform_indices = @transform_0, window_bounds = array<i64: 1, 128>}, {transform_indices = @transform_1, window_bounds = array<i64: 1, 128>}]} {
    %c0 = arith.constant 0 : index
    %c0_0 = arith.constant 0 : index
    %0 = vector.load %arg1[%c0, %c0_0] : memref<1x128xf32, #tpu.memory_space<vmem>>, vector<1x128xf32>
    %cst = arith.constant dense<0.000000e+00> : vector<128xf32>
    %1 = vector.multi_reduction <add>, %0, %cst [0] : vector<1x128xf32> to vector<128xf32>
    %2 = vector.shape_cast %1 : vector<128xf32> to vector<1x128xf32>
    %c0_1 = arith.constant 0 : index
    %c0_2 = arith.constant 0 : index
    %3 = vector.load %arg2[%c0_1, %c0_2] : memref<1x128xf32, #tpu.memory_space<vmem>>, vector<1x128xf32>
    tpu.vector_store %arg2[%c0_1, %c0_2], %2 {strides = array<i32>} : memref<1x128xf32, #tpu.memory_space<vmem>>, vector<1x128xf32>,
    return
  }
  func.func @transform_0(%arg0: i32) -> (i32, i32) {
    %c0_i32 = arith.constant 0 : i32
    %c0_i32_0 = arith.constant 0 : i32
    return %arg0, %c0_i32 : i32, i32
  }
  func.func @transform_1(%arg0: i32) -> (i32, i32) {
    %c0_i32 = arith.constant 0 : i32
    %c0_i32_0 = arith.constant 0 : i32
    return %arg0, %c0_i32 : i32, i32
  }
}

</mosaic_0001>

<bundles_post_ra>
// kernel: fm_forward.1
= control target key start
LH: loop header
LB: loop body
LE: loop exit
PB: predicated region body
PF: predicated region fallthrough
CT: control target
= control target key end

     0   :  { %s31_s0 = inlined_call_operand.vmem [shape: f32[1,128], index: 0, kind: input, shape index: {}]   ;;  %s32_s1 = inlined_call_operand.vmem [shape: f32[1,128], index: 1, kind: output, shape index: {}]  }
   0x1   :  { %v8_v0 = vld [vmem:[%s31_s0] sm:$0x1] }
   0x2   :  { %10 = vst [vmem:[%s32_s1] sm:$0x1] %v8_v0 }

</bundles_post_ra>
